<compile_context>
chip_gen: v6e
topology: v6e:2x2x1
jax: 0.10.0
libtpu: 0.0.40
codegen_flags: <defaults>
</compile_context>

<pallas_src>
import functools

import jax
import jax.numpy as jnp
from jax import lax
from jax.experimental import pallas as pl
from jax.experimental.pallas import tpu as pltpu


def _round_up(x, m):
    return ((x + m - 1) // m) * m


def _pick_block(dim, unit, max_block):
    """Largest multiple of `unit` that divides `dim` and is <= max_block.

    `dim` must already be a multiple of `unit`, so the result is always a
    valid tile size and tiles the dim exactly (no padding waste).
    """
    max_block = max(max_block, unit)
    n_units = dim // unit
    best = unit
    for d in range(1, n_units + 1):
        if n_units % d == 0 and d * unit <= max_block:
            best = d * unit
    return best


def _activate(x, nonlinearity):
    if nonlinearity == "tanh":
        return jnp.tanh(x)
    if nonlinearity == "relu":
        return jnp.maximum(x, 0.0)
    raise RuntimeError("Unknown nonlinearity: {}".format(nonlinearity))


def _rnn_cell_kernel_single(xh_ref, w_ref, o_ref, *, nonlinearity, precision):
    """Full-K block: dot -> activation -> output, no accumulator scratch."""
    out = jnp.dot(
        xh_ref[...], w_ref[...],
        preferred_element_type=jnp.float32,
        precision=precision,
    )
    o_ref[...] = _activate(out, nonlinearity).astype(o_ref.dtype)


def _rnn_cell_kernel_multi(xh_ref, w_ref, o_ref, acc_ref, *, nonlinearity,
                           precision):
    """K-tiled reduction with a VMEM f32 accumulator.

    Grid = (M/bm, N/bn, K/bk), K innermost ("arbitrary"); the output BlockSpec
    maps the same (i, j) tile for every k, so acc persists across K steps.
    First K step writes the dot result directly (no zero-init + add).
    """
    k = pl.program_id(2)
    prod = jnp.dot(
        xh_ref[...], w_ref[...],
        preferred_element_type=jnp.float32,
        precision=precision,
    )

    @pl.when(k == 0)
    def _first():
        acc_ref[...] = prod

    @pl.when(k > 0)
    def _accumulate():
        acc_ref[...] += prod

    @pl.when(k == pl.num_programs(2) - 1)
    def _finalize():
        o_ref[...] = _activate(acc_ref[...], nonlinearity).astype(o_ref.dtype)


def fuse_rnn_weights(weight_ih, weight_hh):
    """Fuse [W_ih; W_hh] along K and pad to (8,128)-friendly tiles.

    Call ONCE at parameter-init time (analogue of reset_parameters), not per
    forward step — the padded zero K rows / N columns are benign
    (tanh(0)=relu(0)=0 and padded output columns are sliced off).
    """
    in_features, out_features = weight_ih.shape
    assert weight_hh.shape == (out_features, out_features)
    K = in_features + out_features
    Kp = _round_up(K, 128)
    Np = _round_up(out_features, 128)
    w = jnp.concatenate([weight_ih, weight_hh], axis=0)
    if (Kp, Np) != (K, out_features):
        w = jnp.pad(w, ((0, Kp - K), (0, Np - out_features)))
    return w


def recurrent_layer_forward(inputs, h, w_fused, nonlinearity="tanh",
                            precision=lax.Precision.HIGHEST,
                            block_m=256, block_n=512, block_k=1024):
    """Pallas implementation of RecurrentLayer.forward (single cell step).

    inputs  : [B, in_features]
    h       : [B, out_features]
    w_fused : pre-fused/padded weights from fuse_rnn_weights(W_ih, W_hh)
    returns : [B, out_features]
    """
    if nonlinearity not in ("tanh", "relu"):
        raise RuntimeError("Unknown nonlinearity: {}".format(nonlinearity))

    M, in_features = inputs.shape
    Mh, out_features = h.shape
    assert Mh == M
    K = in_features + out_features
    N = out_features
    Kp, Np = w_fused.shape
    assert Kp == _round_up(K, 128) and Np == _round_up(N, 128), (
        "w_fused must come from fuse_rnn_weights(weight_ih, weight_hh)")

    out_dtype = inputs.dtype
    # Minimum sublane tile: 8 for 32-bit, 16 for bf16/f16, 32 for 8-bit.
    sub = max(8, 32 // jnp.dtype(out_dtype).itemsize)
    Mp = _round_up(M, sub)

    # Per-step activation concat/pad only (small, fuses under jit); weights
    # are already fused/padded at init time.
    xh = jnp.concatenate([inputs, h.astype(out_dtype)], axis=1)
    if (Mp, Kp) != (M, K):
        xh = jnp.pad(xh, ((0, Mp - M), (0, Kp - K)))

    # Tiles are exact divisors of the rounded dims — zero padding waste.
    bm = _pick_block(Mp, sub, block_m)
    bn = _pick_block(Np, 128, block_n)
    bk = _pick_block(Kp, 128, block_k)
    # v7x: make sure a "parallel" axis has >=2 tiles so both TensorCores get
    # work; a no-op on the single-core v5e/v6e.
    if Mp // bm == 1 and Np // bn == 1 and Np // 128 >= 2:
        bn = _pick_block(Np, 128, Np // 2)

    m_tiles, n_tiles, k_tiles = Mp // bm, Np // bn, Kp // bk

    if k_tiles == 1:
        # Full-K weight block: no K grid, no accumulator round-trip.
        kernel = functools.partial(_rnn_cell_kernel_single,
                                   nonlinearity=nonlinearity,
                                   precision=precision)
        out_padded = pl.pallas_call(
            kernel,
            out_shape=jax.ShapeDtypeStruct((Mp, Np), out_dtype),
            grid_spec=pltpu.PrefetchScalarGridSpec(
                num_scalar_prefetch=0,
                grid=(m_tiles, n_tiles),
                in_specs=[
                    pl.BlockSpec((bm, Kp), lambda i, j: (i, 0)),
                    pl.BlockSpec((Kp, bn), lambda i, j: (0, j)),
                ],
                out_specs=pl.BlockSpec((bm, bn), lambda i, j: (i, j)),
            ),
            compiler_params=pltpu.CompilerParams(
                dimension_semantics=("parallel", "parallel"),
                vmem_limit_bytes=32 * 1024 * 1024,
            ),
        )(xh, w_fused)
    else:
        kernel = functools.partial(_rnn_cell_kernel_multi,
                                   nonlinearity=nonlinearity,
                                   precision=precision)
        out_padded = pl.pallas_call(
            kernel,
            out_shape=jax.ShapeDtypeStruct((Mp, Np), out_dtype),
            grid_spec=pltpu.PrefetchScalarGridSpec(
                num_scalar_prefetch=0,
                grid=(m_tiles, n_tiles, k_tiles),
                in_specs=[
                    pl.BlockSpec((bm, bk), lambda i, j, k: (i, k)),
                    pl.BlockSpec((bk, bn), lambda i, j, k: (k, j)),
                ],
                out_specs=pl.BlockSpec((bm, bn), lambda i, j, k: (i, j)),
                scratch_shapes=[pltpu.VMEM((bm, bn), jnp.float32)],
            ),
            compiler_params=pltpu.CompilerParams(
                dimension_semantics=("parallel", "parallel", "arbitrary"),
                vmem_limit_bytes=32 * 1024 * 1024,
            ),
        )(xh, w_fused)

    # Slice only if padding was actually added.
    if (Mp, Np) != (M, N):
        out_padded = out_padded[:M, :N]
    return out_padded


def reference_forward(inputs, h, weight_ih, weight_hh, nonlinearity="tanh"):
    out = (jnp.dot(inputs, weight_ih, precision=lax.Precision.HIGHEST)
           + jnp.dot(h, weight_hh, precision=lax.Precision.HIGHEST))
    if nonlinearity == "tanh":
        return jnp.tanh(out)
    return jnp.maximum(out, 0.0)


if __name__ == "__main__":
    key = jax.random.PRNGKey(0)
    (k_x, k_h, k_wih, k_whh,
     k_x2, k_h2, k_wih2, k_whh2) = jax.random.split(key, 8)

    # ---- Small single-step check (module-sized shapes) ---------------------
    batch, in_features, out_features = 8, 16, 32
    x = jax.random.normal(k_x, (batch, in_features), dtype=jnp.float32)
    h = jax.random.normal(k_h, (batch, out_features), dtype=jnp.float32)
    w_ih = jax.random.normal(k_wih, (in_features, out_features), dtype=jnp.float32)
    w_hh = jax.random.normal(k_whh, (out_features, out_features), dtype=jnp.float32)

    # Fuse/pad parameters ONCE at init time (not per step).
    w_fused = fuse_rnn_weights(w_ih, w_hh)

    fwd_tanh = jax.jit(functools.partial(recurrent_layer_forward, nonlinearity="tanh"))
    fwd_relu = jax.jit(functools.partial(recurrent_layer_forward, nonlinearity="relu"))

    out = jax.block_until_ready(fwd_tanh(x, h, w_fused))
    ref = reference_forward(x, h, w_ih, w_hh, "tanh")
    assert out.shape == (batch, out_features)
    assert jnp.allclose(out, ref, atol=1e-5, rtol=1e-5)

    out_relu = jax.block_until_ready(fwd_relu(x, h, w_fused))
    ref_relu = reference_forward(x, h, w_ih, w_hh, "relu")
    assert jnp.allclose(out_relu, ref_relu, atol=1e-5, rtol=1e-5)

    # ---- Exercise the K-tiled accumulator path (still small) ---------------
    b2, in2, out2 = 16, 160, 256   # K = 416 -> Kp = 512; block_k=128 -> 4 K steps
    x2 = jax.random.normal(k_x2, (b2, in2), dtype=jnp.float32)
    h2 = jax.random.normal(k_h2, (b2, out2), dtype=jnp.float32)
    w_ih2 = jax.random.normal(k_wih2, (in2, out2), dtype=jnp.float32)
    w_hh2 = jax.random.normal(k_whh2, (out2, out2), dtype=jnp.float32)
    w_fused2 = fuse_rnn_weights(w_ih2, w_hh2)

    fwd2 = jax.jit(functools.partial(recurrent_layer_forward,
                                     nonlinearity="tanh",
                                     block_k=128, block_n=256))
    out2_v = jax.block_until_ready(fwd2(x2, h2, w_fused2))
    ref2 = reference_forward(x2, h2, w_ih2, w_hh2, "tanh")
    assert out2_v.shape == (b2, out2)
    assert jnp.allclose(out2_v, ref2, atol=1e-4, rtol=1e-4)

    print("KERNEL_OK")
</pallas_src>

<mosaic_0001>
module attributes {stable_mosaic.version = 11 : i64} {
  func.func @_rnn_cell_kernel_single(%arg0: i32, %arg1: i32, %arg2: memref<8x128xf32, #tpu.memory_space<vmem>>, %arg3: memref<128x128xf32, #tpu.memory_space<vmem>>, %arg4: memref<8x128xf32, #tpu.memory_space<vmem>>) attributes {dimension_semantics = [#tpu.dimension_semantics<parallel>, #tpu.dimension_semantics<parallel>], iteration_bounds = array<i64: 1, 1>, scalar_prefetch = 0 : i64, scratch_operands = 0 : i64, tpu.core_type = #tpu.core_type<tc>, window_params = [{transform_indices = @transform_0, window_bounds = array<i64: 8, 128>}, {transform_indices = @transform_1, window_bounds = array<i64: 128, 128>}, {transform_indices = @transform_2, window_bounds = array<i64: 8, 128>}]} {
    %c0 = arith.constant 0 : index
    %c0_0 = arith.constant 0 : index
    %0 = vector.load %arg2[%c0, %c0_0] : memref<8x128xf32, #tpu.memory_space<vmem>>, vector<8x128xf32>
    %c0_1 = arith.constant 0 : index
    %c0_2 = arith.constant 0 : index
    %1 = vector.load %arg3[%c0_1, %c0_2] : memref<128x128xf32, #tpu.memory_space<vmem>>, vector<128x128xf32>
    %cst = arith.constant dense<0.000000e+00> : vector<8x128xf32>
    %2 = tpu.matmul %0, %1, %cst {dimension_numbers = #tpu.dot_dimension_numbers<[1], [0], [0], [1], [0, 0, 1, 1], [], []>, precision = #tpu.contract_precision<fp32>} : vector<8x128xf32>, vector<128x128xf32>, vector<8x128xf32> -> vector<8x128xf32>
    %3 = math.tanh %2 : vector<8x128xf32>
    %c0_3 = arith.constant 0 : index
    %c0_4 = arith.constant 0 : index
    %4 = vector.load %arg4[%c0_3, %c0_4] : memref<8x128xf32, #tpu.memory_space<vmem>>, vector<8x128xf32>
    tpu.vector_store %arg4[%c0_3, %c0_4], %3 {strides = array<i32>} : memref<8x128xf32, #tpu.memory_space<vmem>>, vector<8x128xf32>,
    return
  }
  func.func @transform_0(%arg0: i32, %arg1: i32) -> (i32, i32) {
    %c0_i32 = arith.constant 0 : i32
    %c0_i32_0 = arith.constant 0 : i32
    return %arg0, %c0_i32 : i32, i32
  }
  func.func @transform_1(%arg0: i32, %arg1: i32) -> (i32, i32) {
    %c0_i32 = arith.constant 0 : i32
    %c0_i32_0 = arith.constant 0 : i32
    return %c0_i32, %arg1 : i32, i32
  }
  func.func @transform_2(%arg0: i32, %arg1: i32) -> (i32, i32) {
    %c0_i32 = arith.constant 0 : i32
    return %arg0, %arg1 : i32, i32
  }
}

</mosaic_0001>

<bundles_post_ra>
// kernel: recurrent_layer_forward.1
= control target key start
LH: loop header
LB: loop body
LE: loop exit
PB: predicated region body
PF: predicated region fallthrough
CT: control target
= control target key end

     0   :  { %7 = vsyncpa [#allocation3], 0  ;;  %s1458_s0 = inlined_call_operand.vmem [shape: f32[8,128], index: 0, kind: input, shape index: {}]   ;;  %s1459_s1 = inlined_call_operand.hbm [shape: f32[128,128], index: 1, kind: input, shape index: {}]   ;;  %s1460_s2 = inlined_call_operand.hbm [shape: f32[8,128], index: 2, kind: output, shape index: {}]  }
   0x1   :  { %8 = vsyncpa [#allocation4], 0  ;;  %s1065_s9 = smov [#allocation2]  }
   0x2   :  { %s16_s10 = sshll.u32 %s1065_s9, 4  ;;  %s17_s10 = int_to_ptr.vmem [resolvable:$true] %s16_s10 }
   0x3   :  { %s1029_s11 = scalar_lea.vmem %s17_s10, 2048  ;;  %p1034_p1 = scmp.lt.s32.totalorder %s17_s10, %s17_s10 }
   0x4   :  { %p1030_p0 = scmp.ne.s32.totalorder %s17_s10, %s1029_s11  ;;  %p1035_p2 = scmp.lt.s32.totalorder %s1029_s11, %s1029_s11 }
   0x6   :  { %p1036_p3 = por %p1035_p2, %p1034_p1 }
   0x8   :  { %p1037_p4 = pnand %p1036_p3, %p1030_p0 }
   0xa   :  { %1040 = shalt.err (!%p1037_p4)
}
   0xb   :  { %s1066_s12 = smov 128   ;;  %s1067_s13 = smov 8  }
   0xc   :  { %22 = dma.hbm_to_vmem [thread:$0]  %s1459_s1, 2048, %s17_s10, [#allocation3], %s1066_s12, %s1066_s12, %s1067_s13  }
   0xd   :  { %1061 = dma.done.wait [#allocation3], 2048  }
   0xe   :  { %1062 = vsyncadd [#allocation3], 4294965248  ;;  %v1068_v0 = vmov 0.0   ;;  %vm1069_vm0 = vmmov 0   ;;  %v42_v1 = vld [vmem:[#allocation2 + $0x78] sm:$0xff]  ;;  %v41_v2 = vld [vmem:[#allocation2 + $0x70] sm:$0xff] }
   0xf   :  { %803 = vmatprep.subr.mxu0 %v1068_v0  ;;  %838 = vmatprep.subr.mxu1 %v1068_v0  ;;  %v40_v3 = vld [vmem:[#allocation2 + $0x68] sm:$0xff]  ;;  %v1095_v4 = vand.u32 4294901760, %v42_v1  ;;  %v1097_v5 = vand.u32 4294901760, %v41_v2  ;;  %v39_v7 = vld [vmem:[#allocation2 + $0x60] sm:$0xff]  ;;  %v38_v8 = vld [vmem:[#allocation2 + $0x58] sm:$0xff] }
  0x10   :  { %835 = vmatprep.mubr.msk.f32.mxu0 %vm1069_vm0, %v1068_v0  ;;  %870 = vmatprep.mubr.msk.f32.mxu1 %vm1069_vm0, %v1068_v0  ;;  %v1099_v6 = vand.u32 4294901760, %v40_v3  ;;  %v37_v9 = vld [vmem:[#allocation2 + $0x50] sm:$0xff]  ;;  %v1101_v10 = vand.u32 4294901760, %v39_v7  ;;  %v1103_v11 = vand.u32 4294901760, %v38_v8  ;;  %v36_v13 = vld [vmem:[#allocation2 + $0x48] sm:$0xff]  ;;  %v35_v14 = vld [vmem:[#allocation2 + $0x40] sm:$0xff] }
  0x11   :  { %v1105_v12 = vand.u32 4294901760, %v37_v9  ;;  %804 = vmatpush3.msra.mxu0 %v1095_v4  ;;  %v1109_v15 = vsub.f32 %v42_v1, %v1095_v4  ;;  %v1112_v16 = vsub.f32 %v41_v2, %v1097_v5  ;;  %v1114_v17 = vand.u32 4294901760, %v36_v13  ;;  %v34_v19 = vld [vmem:[#allocation2 + $0x38] sm:$0xff]  ;;  %v33_v26 = vld [vmem:[#allocation2 + $0x30] sm:$0xff]  ;;  %v32_v36 = vld [vmem:[#allocation2 + $0x28] sm:$0xff] }
  0x12   :  { %v1117_v18 = vsub.f32 %v40_v3, %v1099_v6  ;;  %805 = vmatprep.subr.mxu0 %v1068_v0  ;;  %v1121_v20 = vsub.f32 %v39_v7, %v1101_v10  ;;  %v1124_v21 = vsub.f32 %v38_v8, %v1103_v11  ;;  %v1130_v25 = vand.u32 4294901760, %v35_v14  ;;  %v31_v41 = vld [vmem:[#allocation2 + $0x20] sm:$0xff]  ;;  %v30_v49 = vld [vmem:[#allocation2 + $0x18] sm:$0xff]  ;;  %v29_v54 = vld [vmem:[#allocation2 + $0x10] sm:$0xff] }
  0x13   :  { %806 = vmatpush3.msra.mxu0 %v1097_v5  ;;  %v137_v22 = vand.u32 4294901760, %v1109_v15  ;;  %v144_v23 = vand.u32 4294901760, %v1112_v16  ;;  %v1134_v28 = vand.u32 4294901760, %v34_v19  ;;  %v1138_v30 = vsub.f32 %v37_v9, %v1105_v12  ;;  %v26_v50 = vld [vmem:[%s1458_s0] sm:$0xff]  ;;  %v28_v60 = vld [vmem:[#allocation2 + $0x8] sm:$0xff]  ;;  %s1070_s0 = smov [#allocation5]  }
  0x14   :  { %v151_v24 = vand.u32 4294901760, %v1117_v18  ;;  %807 = vmatprep.subr.mxu0 %v1068_v0  ;;  %v158_v27 = vand.u32 4294901760, %v1121_v20  ;;  %v165_v29 = vand.u32 4294901760, %v1124_v21  ;;  %v1151_v34 = vsub.f32 %v36_v13, %v1114_v17  ;;  %v27_v7 = vld [vmem:[#allocation2] sm:$0xff]  ;;  %s692_s17 = sshll.u32 %s1070_s0, 4  ;;  %s693_s17 = int_to_ptr.vmem [resolvable:$true] %s692_s17 }
  0x15   :  { %808 = vmatpush3.msra.mxu0 %v1099_v6  ;;  %v138_v31 = vsub.f32 %v1109_v15, %v137_v22  ;;  %v145_v32 = vsub.f32 %v1112_v16, %v144_v23  ;;  %v1154_v35 = vand.u32 4294901760, %v33_v26  ;;  %v172_v40 = vand.u32 4294901760, %v1138_v30  ;;  %s1041_s18 = scalar_lea.vmem %s693_s17, 128  ;;  %p1046_p6 = scmp.lt.s32.totalorder %s693_s17, %s693_s17 }
  0x16   :  { %v152_v33 = vsub.f32 %v1117_v18, %v151_v24  ;;  %809 = vmatprep.subr.mxu0 %v1068_v0  ;;  %v159_v39 = vsub.f32 %v1121_v20, %v158_v27  ;;  %v166_v42 = vsub.f32 %v1124_v21, %v165_v29  ;;  %v1166_v43 = vsub.f32 %v35_v14, %v1130_v25  ;;  %p1042_p5 = scmp.ne.s32.totalorder %s693_s17, %s1041_s18  ;;  %p1047_p7 = scmp.lt.s32.totalorder %s1041_s18, %s1041_s18 }
  0x17   :  { %810 = vmatpush3.msra.mxu0 %v1101_v10  ;;  %v139_v37 = vand.u32 4294901760, %v138_v31  ;;  %v146_v38 = vand.u32 4294901760, %v145_v32  ;;  %v1169_v45 = vand.u32 4294901760, %v32_v36  ;;  %v179_v46 = vand.u32 4294901760, %v1151_v34 }
  0x18   :  { %811 = vmatprep.subr.mxu0 %v1068_v0  ;;  %v153_v44 = vand.u32 4294901760, %v152_v33  ;;  %v1173_v47 = vsub.f32 %v34_v19, %v1134_v28  ;;  %v1177_v48 = vand.u32 4294901760, %v31_v41  ;;  %v160_v51 = vand.u32 4294901760, %v159_v39  ;;  %p1048_p8 = por %p1047_p7, %p1046_p6 }
  0x19   :  { %812 = vmatpush3.msra.mxu0 %v1103_v11  ;;  %839 = vmatpush3.msra.mxu1 %v139_v37  ;;  %v173_v52 = vsub.f32 %v1138_v30, %v172_v40  ;;  %v186_v53 = vand.u32 4294901760, %v1166_v43  ;;  %v1188_v55 = vsub.f32 %v33_v26, %v1154_v35  ;;  %v167_v56 = vand.u32 4294901760, %v166_v42 }
  0x1a   :  { %813 = vmatprep.subr.mxu0 %v1068_v0  ;;  %840 = vmatprep.subr.mxu1 %v1068_v0  ;;  %v193_v57 = vand.u32 4294901760, %v1173_v47  ;;  %v180_v58 = vsub.f32 %v1151_v34, %v179_v46  ;;  %v1197_v59 = vand.u32 4294901760, %v30_v49  ;;  %v1200_v61 = vsub.f32 %v32_v36, %v1169_v45  ;;  %p1049_p9 = pnand %p1048_p8, %p1042_p5 }
  0x1b   :  { %814 = vmatpush3.msra.mxu0 %v1105_v12  ;;  %841 = vmatpush3.msra.mxu1 %v146_v38  ;;  %v1202_v62 = vand.u32 4294901760, %v26_v50  ;;  %v1206_v63 = vand.u32 4294901760, %v29_v54  ;;  %v174_v1 = vand.u32 4294901760, %v173_v52  ;;  %v187_v2 = vsub.f32 %v1166_v43, %v186_v53 }
  0x1c   :  { %815 = vmatprep.subr.mxu0 %v1068_v0  ;;  %842 = vmatprep.subr.mxu1 %v1068_v0  ;;  %v200_v3 = vand.u32 4294901760, %v1188_v55  ;;  %v1214_v8 = vsub.f32 %v31_v41, %v1177_v48  ;;  %v194_v9 = vsub.f32 %v1173_v47, %v193_v57  ;;  %v1221_v13 = vand.u32 4294901760, %v28_v60 }
  0x1d   :  { %816 = vmatpush3.msra.mxu0 %v1114_v17  ;;  %843 = vmatpush3.msra.mxu1 %v153_v44  ;;  %v181_v14 = vand.u32 4294901760, %v180_v58  ;;  %v207_v19 = vand.u32 4294901760, %v1200_v61  ;;  %v1226_v26 = vsub.f32 %v26_v50, %v1202_v62  ;;  %v1229_v31 = vsub.f32 %v30_v49, %v1197_v59 }
  0x1e   :  { %817 = vmatprep.subr.mxu0 %v1068_v0  ;;  %844 = vmatprep.subr.mxu1 %v1068_v0  ;;  %v1233_v32 = vand.u32 4294901760, %v27_v7  ;;  %v188_v33 = vand.u32 4294901760, %v187_v2  ;;  %v201_v36 = vsub.f32 %v1188_v55, %v200_v3  ;;  %v214_v37 = vand.u32 4294901760, %v1214_v8 }
  0x1f   :  { %818 = vmatpush3.msra.mxu0 %v1130_v25  ;;  %845 = vmatpush3.msra.mxu1 %v160_v51  ;;  %v1241_v38 = vsub.f32 %v29_v54, %v1206_v63  ;;  %v195_v39 = vand.u32 4294901760, %v194_v9  ;;  %v208_v41 = vsub.f32 %v1200_v61, %v207_v19  ;;  %v126_v42 = vand.u32 4294901760, %v1226_v26 }
  0x20   :  { %819 = vmatprep.subr.mxu0 %v1068_v0  ;;  %846 = vmatprep.subr.mxu1 %v1068_v0  ;;  %v221_v44 = vand.u32 4294901760, %v1229_v31  ;;  %v1252_v49 = vsub.f32 %v28_v60, %v1221_v13  ;;  %v202_v50 = vand.u32 4294901760, %v201_v36  ;;  %v215_v51 = vsub.f32 %v1214_v8, %v214_v37 }
  0x21   :  { %820 = vmatpush3.msra.mxu0 %v1134_v28  ;;  %847 = vmatpush3.msra.mxu1 %v167_v56  ;;  %v228_v52 = vand.u32 4294901760, %v1241_v38  ;;  %v1262_v54 = vsub.f32 %v27_v7, %v1233_v32  ;;  %v209_v56 = vand.u32 4294901760, %v208_v41  ;;  %v127_v58 = vsub.f32 %v1226_v26, %v126_v42 }
  0x22   :  { %821 = vmatprep.subr.mxu0 %v1068_v0  ;;  %848 = vmatprep.subr.mxu1 %v1068_v0  ;;  %v222_v60 = vsub.f32 %v1229_v31, %v221_v44  ;;  %v216_v2 = vand.u32 4294901760, %v215_v51 }
  0x23   :  { %822 = vmatpush3.msra.mxu0 %v1154_v35  ;;  %849 = vmatpush3.msra.mxu1 %v174_v1  ;;  %v235_v1 = vand.u32 4294901760, %v1252_v49  ;;  %v229_v7 = vsub.f32 %v1241_v38, %v228_v52  ;;  %v242_v9 = vand.u32 4294901760, %v1262_v54 }
  0x24   :  { %823 = vmatprep.subr.mxu0 %v1068_v0  ;;  %850 = vmatprep.subr.mxu1 %v1068_v0 }
  0x25   :  { %824 = vmatpush3.msra.mxu0 %v1169_v45  ;;  %851 = vmatpush3.msra.mxu1 %v181_v14  ;;  %v128_v14 = vand.u32 4294901760, %v127_v58  ;;  %v236_v36 = vsub.f32 %v1252_v49, %v235_v1  ;;  %v243_v41 = vsub.f32 %v1262_v54, %v242_v9 }
  0x26   :  { %825 = vmatprep.subr.mxu0 %v1068_v0  ;;  %852 = vmatprep.subr.mxu1 %v1068_v0 }
  0x27   :  { %826 = vmatpush3.msra.mxu0 %v1177_v48  ;;  %853 = vmatpush3.msra.mxu1 %v188_v33  ;;  %v223_v33 = vand.u32 4294901760, %v222_v60  ;;  %v244_v51 = vand.u32 4294901760, %v243_v41 }
  0x28   :  { %827 = vmatprep.subr.mxu0 %v1068_v0  ;;  %854 = vmatprep.subr.mxu1 %v1068_v0 }
  0x29   :  { %828 = vmatpush3.msra.mxu0 %v1197_v59  ;;  %855 = vmatpush3.msra.mxu1 %v195_v39  ;;  %v230_v39 = vand.u32 4294901760, %v229_v7 }
  0x2a   :  { %829 = vmatprep.subr.mxu0 %v1068_v0  ;;  %856 = vmatprep.subr.mxu1 %v1068_v0 }
  0x2b   :  { %830 = vmatpush3.msra.mxu0 %v1206_v63  ;;  %857 = vmatpush3.msra.mxu1 %v202_v50  ;;  %v237_v50 = vand.u32 4294901760, %v236_v36 }
  0x2c   :  { %831 = vmatprep.subr.mxu0 %v1068_v0  ;;  %858 = vmatprep.subr.mxu1 %v1068_v0 }
  0x2d   :  { %832 = vmatpush3.msra.mxu0 %v1221_v13  ;;  %859 = vmatpush3.msra.mxu1 %v209_v56 }
  0x2e   :  { %833 = vmatprep.subr.mxu0 %v1068_v0  ;;  %860 = vmatprep.subr.mxu1 %v1068_v0 }
  0x2f   :  { %834 = vmatpush3.msra.mxu0 %v1233_v32  ;;  %861 = vmatpush3.msra.mxu1 %v216_v2 }
  0x30   :  { %862 = vmatprep.subr.mxu1 %v1068_v0  ;;  %873 = vmatprep.subr.mxu0 %v1068_v0 }
  0x31   :  { %836 = vmatmul.mubr.f32.vlgmr.msra.gmra.mxu0 %v128_v14  ;;  %863 = vmatpush3.msra.mxu1 %v223_v33 }
  0x32   :  { %874 = vmatpush3.msra.mxu0 %v1109_v15  ;;  %864 = vmatprep.subr.mxu1 %v1068_v0 }
  0x33   :  { %875 = vmatprep.subr.mxu0 %v1068_v0  ;;  %865 = vmatpush3.msra.mxu1 %v230_v39 }
  0x34   :  { %876 = vmatpush3.msra.mxu0 %v1112_v16  ;;  %866 = vmatprep.subr.mxu1 %v1068_v0 }
  0x35   :  { %877 = vmatprep.subr.mxu0 %v1068_v0  ;;  %867 = vmatpush3.msra.mxu1 %v237_v50 }
  0x36   :  { %878 = vmatpush3.msra.mxu0 %v1117_v18  ;;  %868 = vmatprep.subr.mxu1 %v1068_v0 }
  0x37   :  { %879 = vmatprep.subr.mxu0 %v1068_v0  ;;  %869 = vmatpush3.msra.mxu1 %v244_v51 }
  0x38   :  { %880 = vmatpush3.msra.mxu0 %v1121_v20  ;;  %871 = vmatmul.mubr.f32.vlgmr.msra.gmra.mxu1 %v1202_v62 }
  0x39   :  { %881 = vmatprep.subr.mxu0 %v1068_v0  ;;  %908 = vmatprep.subr.mxu1 %v1068_v0 }
  0x3a   :  { %882 = vmatpush3.msra.mxu0 %v1124_v21  ;;  %909 = vmatpush3.msra.mxu1 %v1095_v4 }
  0x3b   :  { %883 = vmatprep.subr.mxu0 %v1068_v0  ;;  %910 = vmatprep.subr.mxu1 %v1068_v0 }
  0x3c   :  { %884 = vmatpush3.msra.mxu0 %v1138_v30  ;;  %911 = vmatpush3.msra.mxu1 %v1097_v5 }
  0x3d   :  { %885 = vmatprep.subr.mxu0 %v1068_v0  ;;  %912 = vmatprep.subr.mxu1 %v1068_v0 }
  0x3e   :  { %886 = vmatpush3.msra.mxu0 %v1151_v34  ;;  %913 = vmatpush3.msra.mxu1 %v1099_v6 }
  0x3f   :  { %887 = vmatprep.subr.mxu0 %v1068_v0  ;;  %914 = vmatprep.subr.mxu1 %v1068_v0 }
  0x40   :  { %888 = vmatpush3.msra.mxu0 %v1166_v43  ;;  %915 = vmatpush3.msra.mxu1 %v1101_v10 }
  0x41   :  { %889 = vmatprep.subr.mxu0 %v1068_v0  ;;  %916 = vmatprep.subr.mxu1 %v1068_v0 }
  0x42   :  { %890 = vmatpush3.msra.mxu0 %v1173_v47  ;;  %917 = vmatpush3.msra.mxu1 %v1103_v11 }
  0x43   :  { %891 = vmatprep.subr.mxu0 %v1068_v0  ;;  %918 = vmatprep.subr.mxu1 %v1068_v0 }
  0x44   :  { %892 = vmatpush3.msra.mxu0 %v1188_v55  ;;  %919 = vmatpush3.msra.mxu1 %v1105_v12 }
  0x45   :  { %893 = vmatprep.subr.mxu0 %v1068_v0  ;;  %920 = vmatprep.subr.mxu1 %v1068_v0 }
  0x46   :  { %894 = vmatpush3.msra.mxu0 %v1200_v61  ;;  %921 = vmatpush3.msra.mxu1 %v1114_v17 }
  0x47   :  { %895 = vmatprep.subr.mxu0 %v1068_v0  ;;  %922 = vmatprep.subr.mxu1 %v1068_v0 }
  0x48   :  { %896 = vmatpush3.msra.mxu0 %v1214_v8  ;;  %923 = vmatpush3.msra.mxu1 %v1130_v25 }
  0x49   :  { %897 = vmatprep.subr.mxu0 %v1068_v0  ;;  %924 = vmatprep.subr.mxu1 %v1068_v0 }
  0x4a   :  { %898 = vmatpush3.msra.mxu0 %v1229_v31  ;;  %925 = vmatpush3.msra.mxu1 %v1134_v28 }
  0x4b   :  { %899 = vmatprep.subr.mxu0 %v1068_v0  ;;  %926 = vmatprep.subr.mxu1 %v1068_v0 }
  0x4c   :  { %900 = vmatpush3.msra.mxu0 %v1241_v38  ;;  %927 = vmatpush3.msra.mxu1 %v1154_v35 }
  0x4d   :  { %901 = vmatprep.subr.mxu0 %v1068_v0  ;;  %928 = vmatprep.subr.mxu1 %v1068_v0 }
  0x4e   :  { %902 = vmatpush3.msra.mxu0 %v1252_v49  ;;  %929 = vmatpush3.msra.mxu1 %v1169_v45 }
  0x4f   :  { %903 = vmatprep.subr.mxu0 %v1068_v0  ;;  %930 = vmatprep.subr.mxu1 %v1068_v0 }
  0x50   :  { %904 = vmatpush3.msra.mxu0 %v1262_v54  ;;  %905 = vmatprep.mubr.msk.f32.mxu0 %vm1069_vm0, %v1068_v0 }
  0x51   :  { %931 = vmatpush3.msra.mxu1 %v1177_v48  ;;  %906 = vmatmul.mubr.f32.vlgmr.msra.gmra.mxu0 %v1226_v26 }
  0x52   :  { %932 = vmatprep.subr.mxu1 %v1068_v0  ;;  %943 = vmatprep.subr.mxu0 %v1068_v0 }
  0x53   :  { %933 = vmatpush3.msra.mxu1 %v1197_v59  ;;  %944 = vmatpush3.msra.mxu0 %v137_v22 }
  0x54   :  { %934 = vmatprep.subr.mxu1 %v1068_v0  ;;  %945 = vmatprep.subr.mxu0 %v1068_v0 }
  0x55   :  { %935 = vmatpush3.msra.mxu1 %v1206_v63  ;;  %946 = vmatpush3.msra.mxu0 %v144_v23 }
  0x56   :  { %936 = vmatprep.subr.mxu1 %v1068_v0  ;;  %947 = vmatprep.subr.mxu0 %v1068_v0 }
  0x57   :  { %937 = vmatpush3.msra.mxu1 %v1221_v13  ;;  %948 = vmatpush3.msra.mxu0 %v151_v24 }
  0x58   :  { %938 = vmatprep.subr.mxu1 %v1068_v0  ;;  %949 = vmatprep.subr.mxu0 %v1068_v0 }
  0x59   :  { %939 = vmatpush3.msra.mxu1 %v1233_v32  ;;  %940 = vmatprep.mubr.msk.f32.mxu1 %vm1069_vm0, %v1068_v0 }
  0x5a   :  { %950 = vmatpush3.msra.mxu0 %v158_v27  ;;  %941 = vmatmul.mubr.f32.vlgmr.msra.gmra.mxu1 %v126_v42 }
  0x5b   :  { %951 = vmatprep.subr.mxu0 %v1068_v0  ;;  %978 = vmatprep.subr.mxu1 %v1068_v0 }
  0x5c   :  { %952 = vmatpush3.msra.mxu0 %v165_v29  ;;  %979 = vmatpush3.msra.mxu1 %v1095_v4 }
  0x5d   :  { %953 = vmatprep.subr.mxu0 %v1068_v0  ;;  %980 = vmatprep.subr.mxu1 %v1068_v0 }
  0x5e   :  { %954 = vmatpush3.msra.mxu0 %v172_v40  ;;  %981 = vmatpush3.msra.mxu1 %v1097_v5 }
  0x5f   :  { %955 = vmatprep.subr.mxu0 %v1068_v0  ;;  %982 = vmatprep.subr.mxu1 %v1068_v0 }
  0x60   :  { %956 = vmatpush3.msra.mxu0 %v179_v46  ;;  %983 = vmatpush3.msra.mxu1 %v1099_v6 }
  0x61   :  { %957 = vmatprep.subr.mxu0 %v1068_v0  ;;  %984 = vmatprep.subr.mxu1 %v1068_v0 }
  0x62   :  { %958 = vmatpush3.msra.mxu0 %v186_v53  ;;  %985 = vmatpush3.msra.mxu1 %v1101_v10 }
  0x63   :  { %959 = vmatprep.subr.mxu0 %v1068_v0  ;;  %986 = vmatprep.subr.mxu1 %v1068_v0 }
  0x64   :  { %960 = vmatpush3.msra.mxu0 %v193_v57  ;;  %987 = vmatpush3.msra.mxu1 %v1103_v11 }
  0x65   :  { %961 = vmatprep.subr.mxu0 %v1068_v0  ;;  %988 = vmatprep.subr.mxu1 %v1068_v0 }
  0x66   :  { %962 = vmatpush3.msra.mxu0 %v200_v3  ;;  %989 = vmatpush3.msra.mxu1 %v1105_v12 }
  0x67   :  { %963 = vmatprep.subr.mxu0 %v1068_v0  ;;  %990 = vmatprep.subr.mxu1 %v1068_v0 }
  0x68   :  { %964 = vmatpush3.msra.mxu0 %v207_v19  ;;  %991 = vmatpush3.msra.mxu1 %v1114_v17 }
  0x69   :  { %965 = vmatprep.subr.mxu0 %v1068_v0  ;;  %992 = vmatprep.subr.mxu1 %v1068_v0 }
  0x6a   :  { %966 = vmatpush3.msra.mxu0 %v214_v37  ;;  %993 = vmatpush3.msra.mxu1 %v1130_v25 }
  0x6b   :  { %967 = vmatprep.subr.mxu0 %v1068_v0  ;;  %994 = vmatprep.subr.mxu1 %v1068_v0 }
  0x6c   :  { %968 = vmatpush3.msra.mxu0 %v221_v44  ;;  %995 = vmatpush3.msra.mxu1 %v1134_v28 }
  0x6d   :  { %969 = vmatprep.subr.mxu0 %v1068_v0  ;;  %996 = vmatprep.subr.mxu1 %v1068_v0 }
  0x6e   :  { %970 = vmatpush3.msra.mxu0 %v228_v52  ;;  %997 = vmatpush3.msra.mxu1 %v1154_v35 }
  0x6f   :  { %971 = vmatprep.subr.mxu0 %v1068_v0  ;;  %998 = vmatprep.subr.mxu1 %v1068_v0 }
  0x70   :  { %972 = vmatpush3.msra.mxu0 %v235_v1  ;;  %999 = vmatpush3.msra.mxu1 %v1169_v45 }
  0x71   :  { %973 = vmatprep.subr.mxu0 %v1068_v0  ;;  %1000 = vmatprep.subr.mxu1 %v1068_v0 }
  0x72   :  { %974 = vmatpush3.msra.mxu0 %v242_v9  ;;  %975 = vmatprep.mubr.msk.f32.mxu0 %vm1069_vm0, %v1068_v0 }
  0x73   :  { %1001 = vmatpush3.msra.mxu1 %v1177_v48  ;;  %976 = vmatmul.mubr.f32.vlgmr.msra.gmra.mxu0 %v1202_v62 }
  0x74   :  { %1002 = vmatprep.subr.mxu1 %v1068_v0  ;;  %1010 = vmatprep.mubr.msk.f32.mxu1 %vm1069_vm0, %v1068_v0 }
  0x75   :  { %1003 = vmatpush3.msra.mxu1 %v1197_v59 }
  0x76   :  { %1004 = vmatprep.subr.mxu1 %v1068_v0 }
  0x77   :  { %1005 = vmatpush3.msra.mxu1 %v1206_v63 }
  0x78   :  { %1006 = vmatprep.subr.mxu1 %v1068_v0 }
  0x79   :  { %1007 = vmatpush3.msra.mxu1 %v1221_v13 }
  0x7a   :  { %1008 = vmatprep.subr.mxu1 %v1068_v0 }
  0x7b   :  { %1009 = vmatpush3.msra.mxu1 %v1233_v32 }
  0x7c   :  { %1011 = vmatmul.mubr.f32.vlgmr.msra.gmra.mxu1 %v1202_v62 }
  0xf1   :  { %v130_v4 = vpop.f32.mrf.mxu0 }
  0xf3   :  { %v837_v5 = vpop.f32.mrf.mxu0 }
  0xf8   :  { %v281_v6 = vpop.f32.mrf.mxu1 }
  0xf9   :  { %v282_v18 = vadd.f32 %v281_v6, %v130_v4 }
  0xfa   :  { %v872_v10 = vpop.f32.mrf.mxu1 }
 0x111   :  { %v385_v11 = vpop.f32.mrf.mxu0 }
 0x112   :  { %v386_v21 = vadd.f32 %v385_v11, %v282_v18 }
 0x113   :  { %v907_v12 = vpop.f32.mrf.mxu0 }
 0x11a   :  { %v474_v15 = vpop.f32.mrf.mxu1 }
 0x11b   :  { %v475_v22 = vadd.f32 %v474_v15, %v386_v21 }
 0x11c   :  { %v942_v16 = vpop.f32.mrf.mxu1 }
 0x133   :  { %v593_v17 = vpop.f32.mrf.mxu0 }
 0x134   :  { %v594_v23 = vadd.f32 %v593_v17, %v475_v22 }
 0x135   :  { %v977_v20 = vpop.f32.mrf.mxu0 }
 0x13c   :  { %v680_v24 = vpop.f32.mrf.mxu1 }
 0x13d   :  { %v681_v0 = vadd.f32 %v680_v24, %v594_v23 }
 0x13e   :  { %v1012_v25 = vpop.f32.mrf.mxu1 }
 0x13f   :  { %1019 = vtanh.f32 %v681_v0 }
 0x14c   :  { %v1020_v27 = vpop.eup %1019 }
 0x14d   :  { %685 = vst [vmem:[#allocation5] sm:$0xff] %v1020_v27 }
 0x14e   :  { %1052 = shalt.err (!%p1049_p9)
}
 0x14f   :  { %695 = dma.vmem_to_hbm [thread:$0]  %s693_s17, 128, %s1460_s2, [#allocation4]  }
 0x150   :  { %1063 = dma.done.wait [#allocation4], 128  }
 0x151   :  { %1064 = vsyncadd [#allocation4], 4294967168 }
 0x152   :  { %699 = vsyncpa [#allocation3], 1 }
 0x153   :  { %700 = vsyncpa [#allocation4], 1 }

</bundles_post_ra>
